<compile_context>
chip_gen: v5e
topology: v5e:2x2
jax: 0.10.0
libtpu: 0.0.40
codegen_flags: <defaults>
</compile_context>

<pallas_src>
import functools

import numpy as np
import jax
import jax.numpy as jnp
from jax.experimental import pallas as pl
from jax.experimental.pallas import tpu as pltpu


def _grid_loss_kernel(theta_ref, theta_gt_ref, out_ref, *, gram):
    # gram = (Sxx, Syy, Sxy, Sx, Sy, N) of the fixed grid, as Python floats.
    gxx, gyy, gxy, gx, gy, gn = gram

    # Single vectorized VPU subtract over the whole (6, tile_b) tile.
    d = theta_ref[...] - theta_gt_ref[...]          # (6, TB) f32

    # Row slices (sublane extracts; XLU slot, tiny) -> (1, TB) each.
    d00 = d[0:1, :]
    d01 = d[1:2, :]
    dtx = d[2:3, :]
    d10 = d[3:4, :]
    d11 = d[4:5, :]
    dty = d[5:6, :]

    # Quadratic form  dA^T G dA + dB^T G dB  per batch lane.
    loss = (gxx * (d00 * d00 + d10 * d10)
            + gyy * (d01 * d01 + d11 * d11)
            + gn * (dtx * dtx + dty * dty)
            + 2.0 * gxy * (d00 * d01 + d10 * d11)
            + 2.0 * gx * (d00 * dtx + d10 * dty)
            + 2.0 * gy * (d01 * dtx + d11 * dty))    # (1, TB)

    # Lane-dense unmasked store of this tile's per-batch partial losses.
    out_ref[0] = loss


def transformed_grid_loss(theta, theta_gt, grid_size=20):
    assert theta.shape == theta_gt.shape
    assert theta.shape[1] == 6, "affine theta must have 6 parameters"
    batch_size = theta.shape[0]
    n_points = grid_size * grid_size
    inv_bn = 1.0 / float(batch_size * n_points)   # precomputed, no runtime div

    # Constant 3x3 Gram matrix of the fixed grid (f64 -> Python floats).
    axis_coords = np.linspace(-1, 1, grid_size)
    Xg, Yg = np.meshgrid(axis_coords, axis_coords)
    x = Xg.reshape(-1).astype(np.float64)
    y = Yg.reshape(-1).astype(np.float64)
    gram = (float(np.dot(x, x)), float(np.dot(y, y)), float(np.dot(x, y)),
            float(np.sum(x)), float(np.sum(y)), float(n_points))

    # Batch along lanes, padded to a multiple of 128; large batches take
    # 512 lanes per grid step to amortize the ~0.35 us per-step overhead.
    b_pad128 = pl.cdiv(batch_size, 128) * 128
    tile_b = min(512, b_pad128)
    b_pad = pl.cdiv(b_pad128, tile_b) * tile_b
    num_tiles = b_pad // tile_b

    theta32 = jnp.asarray(theta, jnp.float32)
    theta_gt32 = jnp.asarray(theta_gt, jnp.float32)
    if b_pad != batch_size:
        # Zero-padded rows give d == 0 -> contribute exactly 0.
        pad = ((0, b_pad - batch_size), (0, 0))
        theta32 = jnp.pad(theta32, pad)
        theta_gt32 = jnp.pad(theta_gt32, pad)

    # (6, B_pad): batch on the lane axis, 6 coefficients on sublanes.
    theta_t = theta32.T
    theta_gt_t = theta_gt32.T

    kernel = functools.partial(_grid_loss_kernel, gram=gram)

    partial = pl.pallas_call(
        kernel,
        out_shape=jax.ShapeDtypeStruct((num_tiles, 1, tile_b), jnp.float32),
        grid=(num_tiles,),
        in_specs=[
            pl.BlockSpec((6, tile_b), lambda i: (0, i)),
            pl.BlockSpec((6, tile_b), lambda i: (0, i)),
        ],
        out_specs=pl.BlockSpec((1, 1, tile_b), lambda i: (i, 0, 0)),
        compiler_params=pltpu.CompilerParams(
            # Each grid step writes its own output block -> fully parallel
            # batch axis (v7x dual-TC friendly; neutral on v5e/v6e).
            dimension_semantics=("parallel",)),
    )(theta_t, theta_gt_t)

    return jnp.sum(partial) * inv_bn


def _reference_loss(theta, theta_gt, grid_size=20):
    axis_coords = np.linspace(-1, 1, grid_size)
    Xg, Yg = np.meshgrid(axis_coords, axis_coords)
    P = jnp.asarray(
        np.stack([Xg.reshape(-1), Yg.reshape(-1)], axis=0).astype(np.float32))
    b = theta.shape[0]

    def aff(t):
        m = t.reshape(b, 2, 3)
        return jnp.einsum('bij,jn->bin', m[:, :, :2], P) + m[:, :, 2:3]

    d = aff(theta) - aff(theta_gt)
    return jnp.mean(jnp.sum(d * d, axis=1))


if __name__ == "__main__":
    key = jax.random.PRNGKey(0)
    k1, k2 = jax.random.split(key)
    B = 2
    identity = jnp.array([1., 0., 0., 0., 1., 0.], dtype=jnp.float32)
    theta = identity[None, :] + 0.1 * jax.random.normal(k1, (B, 6), jnp.float32)
    theta_gt = identity[None, :] + 0.1 * jax.random.normal(k2, (B, 6), jnp.float32)

    loss = transformed_grid_loss(theta, theta_gt, grid_size=20)
    loss = jax.block_until_ready(loss)

    ref = jax.block_until_ready(_reference_loss(theta, theta_gt, grid_size=20))
    assert np.allclose(np.asarray(loss), np.asarray(ref), rtol=1e-4, atol=1e-6), \
        f"mismatch: kernel={float(loss)} ref={float(ref)}"

    print("KERNEL_OK")
</pallas_src>

<mosaic_0001>
module attributes {stable_mosaic.version = 11 : i64} {
  func.func @_grid_loss_kernel(%arg0: i32, %arg1: memref<6x128xf32, #tpu.memory_space<vmem>>, %arg2: memref<6x128xf32, #tpu.memory_space<vmem>>, %arg3: memref<1x1x128xf32, #tpu.memory_space<vmem>>) attributes {dimension_semantics = [#tpu.dimension_semantics<parallel>], iteration_bounds = array<i64: 1>, scalar_prefetch = 0 : i64, scratch_operands = 0 : i64, tpu.core_type = #tpu.core_type<tc>, window_params = [{transform_indices = @transform_0, window_bounds = array<i64: 6, 128>}, {transform_indices = @transform_1, window_bounds = array<i64: 6, 128>}, {transform_indices = @transform_2, window_bounds = array<i64: 1, 1, 128>}]} {
    %c0 = arith.constant 0 : index
    %c0_0 = arith.constant 0 : index
    %0 = vector.load %arg1[%c0, %c0_0] : memref<6x128xf32, #tpu.memory_space<vmem>>, vector<6x128xf32>
    %c0_1 = arith.constant 0 : index
    %c0_2 = arith.constant 0 : index
    %1 = vector.load %arg2[%c0_1, %c0_2] : memref<6x128xf32, #tpu.memory_space<vmem>>, vector<6x128xf32>
    %2 = arith.subf %0, %1 : vector<6x128xf32>
    %3 = vector.extract_strided_slice %2 {offsets = [0, 0], sizes = [1, 128], strides = [1, 1]} : vector<6x128xf32> to vector<1x128xf32>
    %4 = vector.extract_strided_slice %2 {offsets = [1, 0], sizes = [1, 128], strides = [1, 1]} : vector<6x128xf32> to vector<1x128xf32>
    %5 = vector.extract_strided_slice %2 {offsets = [2, 0], sizes = [1, 128], strides = [1, 1]} : vector<6x128xf32> to vector<1x128xf32>
    %6 = vector.extract_strided_slice %2 {offsets = [3, 0], sizes = [1, 128], strides = [1, 1]} : vector<6x128xf32> to vector<1x128xf32>
    %7 = vector.extract_strided_slice %2 {offsets = [4, 0], sizes = [1, 128], strides = [1, 1]} : vector<6x128xf32> to vector<1x128xf32>
    %8 = vector.extract_strided_slice %2 {offsets = [5, 0], sizes = [1, 128], strides = [1, 1]} : vector<6x128xf32> to vector<1x128xf32>
    %9 = arith.mulf %3, %3 : vector<1x128xf32>
    %10 = arith.mulf %6, %6 : vector<1x128xf32>
    %11 = arith.addf %9, %10 : vector<1x128xf32>
    %cst = arith.constant 147.368423 : f32
    %12 = vector.broadcast %cst : f32 to vector<1x128xf32>
    %13 = arith.mulf %12, %11 : vector<1x128xf32>
    %14 = arith.mulf %4, %4 : vector<1x128xf32>
    %15 = arith.mulf %7, %7 : vector<1x128xf32>
    %16 = arith.addf %14, %15 : vector<1x128xf32>
    %cst_3 = arith.constant 147.368423 : f32
    %17 = vector.broadcast %cst_3 : f32 to vector<1x128xf32>
    %18 = arith.mulf %17, %16 : vector<1x128xf32>
    %19 = arith.addf %13, %18 : vector<1x128xf32>
    %20 = arith.mulf %5, %5 : vector<1x128xf32>
    %21 = arith.mulf %8, %8 : vector<1x128xf32>
    %22 = arith.addf %20, %21 : vector<1x128xf32>
    %cst_4 = arith.constant 4.000000e+02 : f32
    %23 = vector.broadcast %cst_4 : f32 to vector<1x128xf32>
    %24 = arith.mulf %23, %22 : vector<1x128xf32>
    %25 = arith.addf %19, %24 : vector<1x128xf32>
    %26 = arith.mulf %3, %4 : vector<1x128xf32>
    %27 = arith.mulf %6, %7 : vector<1x128xf32>
    %28 = arith.addf %26, %27 : vector<1x128xf32>
    %cst_5 = arith.constant -1.55431223E-15 : f32
    %29 = vector.broadcast %cst_5 : f32 to vector<1x128xf32>
    %30 = arith.mulf %29, %28 : vector<1x128xf32>
    %31 = arith.addf %25, %30 : vector<1x128xf32>
    %32 = arith.mulf %3, %5 : vector<1x128xf32>
    %33 = arith.mulf %6, %8 : vector<1x128xf32>
    %34 = arith.addf %32, %33 : vector<1x128xf32>
    %cst_6 = arith.constant -3.55271368E-14 : f32
    %35 = vector.broadcast %cst_6 : f32 to vector<1x128xf32>
    %36 = arith.mulf %35, %34 : vector<1x128xf32>
    %37 = arith.addf %31, %36 : vector<1x128xf32>
    %38 = arith.mulf %4, %5 : vector<1x128xf32>
    %39 = arith.mulf %7, %8 : vector<1x128xf32>
    %40 = arith.addf %38, %39 : vector<1x128xf32>
    %cst_7 = arith.constant -5.68434189E-14 : f32
    %41 = vector.broadcast %cst_7 : f32 to vector<1x128xf32>
    %42 = arith.mulf %41, %40 : vector<1x128xf32>
    %43 = arith.addf %37, %42 : vector<1x128xf32>
    %c0_8 = arith.constant 0 : index
    %c0_9 = arith.constant 0 : index
    %c0_10 = arith.constant 0 : index
    %44 = vector.load %arg3[%c0_8, %c0_9, %c0_10] : memref<1x1x128xf32, #tpu.memory_space<vmem>>, vector<1x1x128xf32>
    %45 = vector.shape_cast %44 : vector<1x1x128xf32> to vector<1x128xf32>
    %46 = vector.shape_cast %43 : vector<1x128xf32> to vector<1x1x128xf32>
    tpu.vector_store %arg3[%c0_8, %c0_9, %c0_10], %46 {strides = array<i32>} : memref<1x1x128xf32, #tpu.memory_space<vmem>>, vector<1x1x128xf32>,
    return
  }
  func.func @transform_0(%arg0: i32) -> (i32, i32) {
    %c0_i32 = arith.constant 0 : i32
    %c0_i32_0 = arith.constant 0 : i32
    return %c0_i32, %arg0 : i32, i32
  }
  func.func @transform_1(%arg0: i32) -> (i32, i32) {
    %c0_i32 = arith.constant 0 : i32
    %c0_i32_0 = arith.constant 0 : i32
    return %c0_i32, %arg0 : i32, i32
  }
  func.func @transform_2(%arg0: i32) -> (i32, i32, i32) {
    %c0_i32 = arith.constant 0 : i32
    %c0_i32_0 = arith.constant 0 : i32
    %c0_i32_1 = arith.constant 0 : i32
    return %arg0, %c0_i32, %c0_i32_0 : i32, i32, i32
  }
}

</mosaic_0001>

<bundles_post_ra>
// kernel: tpu_custom_call.1
= control target key start
LH: loop header
LB: loop body
LE: loop exit
PB: predicated region body
PF: predicated region fallthrough
CT: control target
= control target key end

     0   :  { %7 = vsyncpa [#allocation3], 0  ;;  %s209_s0 = inlined_call_operand.hbm [shape: f32[6,128], index: 0, kind: input, shape index: {}]   ;;  %s210_s1 = inlined_call_operand.hbm [shape: f32[6,128], index: 1, kind: input, shape index: {}]   ;;  %s211_s2 = inlined_call_operand.hbm [shape: f32[1,1,128], index: 2, kind: output, shape index: {}]  }
   0x1   :  { %8 = vsyncpa [#allocation6], 0 }
   0x2   :  { %9 = vsyncpa [#allocation4], 0  ;;  %s15_s11 = sshll.u32 %s209_s0, 4  ;;  %s182_s12 = smov [#allocation2]   ;;  %s16_s11 = int_to_ptr.hbm [resolvable:$true] %s15_s11 }
   0x3   :  { %s17_s13 = sshll.u32 %s182_s12, 4  ;;  %s26_s16 = sshll.u32 %s210_s1, 4  ;;  %s18_s13 = int_to_ptr.vmem [resolvable:$true] %s17_s13  ;;  %s27_s16 = int_to_ptr.hbm [resolvable:$true] %s26_s16 }
   0x4   :  { %20 = dma.hbm_to_vmem [thread:$0]  %s16_s11, 128, %s18_s13, [#allocation3]  }
   0x5   :  { %s183_s17 = smov [#allocation5]  }
   0x6   :  { %s28_s18 = sshll.u32 %s183_s17, 4  ;;  %s29_s18 = int_to_ptr.vmem [resolvable:$true] %s28_s18 }
   0x7   :  { %31 = dma.hbm_to_vmem [thread:$0]  %s27_s16, 128, %s29_s18, [#allocation6]  }
   0x8   :  { %176 = dma.done.wait [#allocation3], 128  }
   0x9   :  { %177 = vsyncadd [#allocation3], 4294967168 }
   0xa   :  { %178 = dma.done.wait [#allocation6], 128  }
   0xb   :  { %179 = vsyncadd [#allocation6], 4294967168  ;;  %v40_v0 = vld [vmem:[#allocation2] sm:$0x3f]  ;;  %v41_v1 = vld [vmem:[#allocation5] sm:$0x3f] }
   0xc   :  { %v42_v2 = vsub.f32 %v40_v0, %v41_v1  ;;  %s184_s0 = smov [#allocation7]   ;;  %s90_s21 = sshll.u32 %s211_s2, 4  ;;  %s91_s21 = int_to_ptr.hbm [resolvable:$true] %s90_s21 }
   0xd   :  { %s88_s1 = sshll.u32 %s184_s0, 4  ;;  %s89_s1 = int_to_ptr.vmem [resolvable:$true] %s88_s1 }
   0xe   :  { %v43_v3 = vmul.f32 %v42_v2, %v42_v2  ;;  %v59_v4 = vrot.slane %v42_v2, 1  ;;  %v68_v5 = vrot.slane %v42_v2, 2 }
  0x10   :  { %v45_v6 = vrot.slane %v43_v3, 3  ;;  %v61_v7 = vmul.f32 %v59_v4, %v42_v2  ;;  %v70_v8 = vmul.f32 %v68_v5, %v42_v2 }
  0x12   :  { %v47_v9 = vadd.f32 %v45_v6, %v43_v3  ;;  %v63_v10 = vrot.slane %v61_v7, 3  ;;  %v72_v11 = vrot.slane %v70_v8, 3 }
  0x14   :  { %v48_v12 = vmul.f32 147.36842, %v47_v9  ;;  %v53_v13 = vmul.f32 400.0, %v47_v9  ;;  %v65_v14 = vadd.f32 %v63_v10, %v61_v7  ;;  %v74_v17 = vadd.f32 %v72_v11, %v70_v8 }
  0x16   :  { %v50_v15 = vrot.slane %v48_v12, 1  ;;  %v55_v16 = vrot.slane %v53_v13, 2  ;;  %v66_v19 = vmul.f32 -1.5543122e-15, %v65_v14  ;;  %v77_v20 = vmul.f32 -5.684342e-14, %v65_v14 }
  0x17   :  { %v75_v22 = vmul.f32 -3.5527137e-14, %v74_v17 }
  0x18   :  { %v52_v18 = vadd.f32 %v50_v15, %v48_v12  ;;  %v79_v24 = vrot.slane %v77_v20, 1 }
  0x1a   :  { %v57_v21 = vadd.f32 %v55_v16, %v52_v18 }
  0x1c   :  { %v67_v23 = vadd.f32 %v66_v19, %v57_v21 }
  0x1e   :  { %v76_v25 = vadd.f32 %v75_v22, %v67_v23 }
  0x20   :  { %v81_v26 = vadd.f32 %v79_v24, %v76_v25 }
  0x22   :  { %82 = vst [vmem:[#allocation7] sm:$0x1] %v81_v26 }
  0x23   :  { %93 = dma.vmem_to_hbm [thread:$0]  %s89_s1, 16, %s91_s21, [#allocation4]  }
  0x24   :  { %180 = dma.done.wait [#allocation4], 16  }
  0x25   :  { %181 = vsyncadd [#allocation4], 4294967280 }
  0x26   :  { %98 = vsyncpa [#allocation3], 1 }
  0x27   :  { %99 = vsyncpa [#allocation6], 1 }
  0x28   :  { %100 = vsyncpa [#allocation4], 1 }

</bundles_post_ra>
